<compile_context>
chip_gen: v5e
topology: v5e:2x2
jax: 0.10.0
libtpu: 0.0.40
codegen_flags: <defaults>
</compile_context>

<pallas_src>
import jax
import jax.numpy as jnp
from jax.experimental import pallas as pl
from jax.experimental.pallas import tpu as pltpu

OUT_PAD = 128  # lane-dense output slab width (one vreg lane extent)


def _round_up(x, m):
    return ((x + m - 1) // m) * m


# -----------------------------------------------------------------------------
# Kernel
# -----------------------------------------------------------------------------
def likelihood_kernel(s_ref, w1_ref, b1_ref, w2_ref, b2_ref, wh_ref, bh_ref,
                      mask_ref, out_ref):
    x = s_ref[...]

    # s_to_hidden: Linear -> ReLU -> Linear -> ReLU (f32 accumulate/elementwise).
    h = jnp.dot(x, w1_ref[...], preferred_element_type=jnp.float32) + b1_ref[...]
    h = jnp.maximum(h, 0.0)
    h = jnp.dot(h.astype(w2_ref.dtype), w2_ref[...],
                preferred_element_type=jnp.float32) + b2_ref[...]
    h = jnp.maximum(h, 0.0)

    # One fused, lane-dense head matmul.  Column layout of `pre`:
    #   [0, o)            mu_o
    #   [o, 2o)           sigma_o pre-activation
    #   [2o, 2o+a)        mu_a
    #   [2o+a, 2o+2a)     sigma_a pre-activation (duplicate of mu_a head)
    #   [2o+2a, 128)      zero padding
    pre = jnp.dot(h.astype(wh_ref.dtype), wh_ref[...],
                  preferred_element_type=jnp.float32) + bh_ref[...]

    # `1e-6 + softplus` only on the sigma columns.  The selector is a tiny
    # resident (1, 128) f32 input (no per-step iota/compare rebuild).
    softplus = 1e-06 + jnp.logaddexp(pre, 0.0)       # stable softplus (EUP)
    sel = jnp.broadcast_to(mask_ref[...], pre.shape) > 0.5
    out_ref[...] = jnp.where(sel, softplus, pre).astype(out_ref.dtype)


# -----------------------------------------------------------------------------
# One-time parameter preparation (hoisted out of the per-call path)
# -----------------------------------------------------------------------------
def prepare_likelihood_params(params, *, use_bf16=False):
    """Fuse head weights/biases into lane-dense slabs and (optionally) cast the
    MXU operands to bf16.  Call once at init; pass the result to every forward.
    """
    s_dim = params["w1"].shape[0]
    o_dim = params["w_mo"].shape[1]
    a_dim = params["w_ma"].shape[1]
    used = 2 * o_dim + 2 * a_dim
    assert used <= OUT_PAD, "head widths exceed one 128-lane slab"

    w_heads = jnp.zeros((s_dim, OUT_PAD), jnp.float32)
    b_heads = jnp.zeros((1, OUT_PAD), jnp.float32)
    segments = (
        (0, params["w_mo"], params["b_mo"]),
        (o_dim, params["w_so"], params["b_so"]),
        (2 * o_dim, params["w_ma"], params["b_ma"]),
        # sigma_a intentionally reuses the mu_a head (reference PyTorch bug).
        (2 * o_dim + a_dim, params["w_ma"], params["b_ma"]),
    )
    for off, wseg, bseg in segments:
        w_heads = w_heads.at[:, off:off + wseg.shape[1]].set(wseg)
        b_heads = b_heads.at[:, off:off + bseg.shape[1]].set(bseg)

    col = jnp.arange(OUT_PAD)
    sp_mask = (((col >= o_dim) & (col < 2 * o_dim)) |
               ((col >= 2 * o_dim + a_dim) & (col < 2 * o_dim + 2 * a_dim)))
    sp_mask = sp_mask.astype(jnp.float32)[None, :]          # (1, OUT_PAD)

    mm_dtype = jnp.bfloat16 if use_bf16 else jnp.float32
    prepared = dict(
        w1=params["w1"].astype(mm_dtype),
        b1=params["b1"].astype(jnp.float32),
        w2=params["w2"].astype(mm_dtype),
        b2=params["b2"].astype(jnp.float32),
        w_heads=w_heads.astype(mm_dtype),
        b_heads=b_heads,
        sp_mask=sp_mask,
    )
    # Materialize now so the per-call forward HLO stays minimal.
    prepared = {k: jax.block_until_ready(v) for k, v in prepared.items()}
    prepared.update(s_dim=s_dim, o_dim=o_dim, a_dim=a_dim, mm_dtype=mm_dtype)
    return prepared


# -----------------------------------------------------------------------------
# Forward pass
# -----------------------------------------------------------------------------
def likelihood_forward(s_t, prepared, *, batch_tile=1024, out_dtype=jnp.float32):
    """Full forward pass as one Pallas call with a 1-D batch grid.

    Returns (mu_o, sigma_o, mu_a, sigma_a).
    """
    B, s_dim = s_t.shape
    assert s_dim == prepared["s_dim"]
    o_dim, a_dim = prepared["o_dim"], prepared["a_dim"]
    mm_dtype = prepared["mm_dtype"]
    out_dtype = jnp.dtype(out_dtype)

    w1, b1 = prepared["w1"], prepared["b1"]
    w2, b2 = prepared["w2"], prepared["b2"]
    w_heads, b_heads, sp_mask = prepared["w_heads"], prepared["b_heads"], prepared["sp_mask"]

    # Sublane-only padding (8 for f32, 16 when any bf16 operand/output is used).
    bf16_anywhere = (mm_dtype == jnp.bfloat16) or (out_dtype == jnp.dtype(jnp.bfloat16))
    sublane = 16 if bf16_anywhere else 8
    b_pad = _round_up(B, sublane)

    s_in = s_t.astype(mm_dtype)
    if b_pad != B:
        s_in = jnp.pad(s_in, ((0, b_pad - B), (0, 0)))   # tiny copy (< sublane rows)

    # Batch tile: as big as the batch (up to batch_tile) to amortize grid-step
    # overhead; ragged last tile handled by pl.cdiv grid (rows are independent).
    tb = _round_up(min(batch_tile, b_pad), sublane)
    # Megacore (v7x): if the whole (large) batch fits in one tile, split in two
    # so the "parallel" axis can shard across both TensorCores.  On 1-TC chips
    # (v5e/v6e) this only adds one ~0.35us grid step on a >=512-row batch.
    if pl.cdiv(b_pad, tb) == 1 and b_pad >= 512:
        tb = _round_up(pl.cdiv(b_pad, 2), sublane)
    grid = (pl.cdiv(b_pad, tb),)

    # Advisory cost estimate (from the true sublane-padded batch).
    flops = 2 * b_pad * (2 * s_dim * s_dim + s_dim * OUT_PAD)
    bytes_accessed = (
        s_in.size * s_in.dtype.itemsize
        + sum(int(a.size) * a.dtype.itemsize
              for a in (w1, b1, w2, b2, w_heads, b_heads, sp_mask))
        + b_pad * OUT_PAD * out_dtype.itemsize
    )
    cost = pl.CostEstimate(flops=int(flops),
                           transcendentals=int(2 * b_pad * OUT_PAD),
                           bytes_accessed=int(bytes_accessed))

    # VMEM budget: double-buffered in/out blocks + resident weights + f32 temps.
    in_block_bytes = tb * s_dim * jnp.dtype(mm_dtype).itemsize
    out_block_bytes = tb * OUT_PAD * out_dtype.itemsize
    resident_bytes = sum(int(a.size) * a.dtype.itemsize
                         for a in (w1, b1, w2, b2, w_heads, b_heads, sp_mask))
    vmem_est = (2 * (in_block_bytes + out_block_bytes)
                + 2 * resident_bytes
                + 8 * tb * OUT_PAD * 4     # headroom for f32 intermediates
                + (2 << 20))
    cp_kwargs = dict(dimension_semantics=("parallel",))
    if vmem_est > (16 << 20):              # only override when huge tiles requested
        cp_kwargs["vmem_limit_bytes"] = int(vmem_est)

    slab = pl.pallas_call(
        likelihood_kernel,
        out_shape=jax.ShapeDtypeStruct((b_pad, OUT_PAD), out_dtype),
        grid=grid,
        in_specs=[
            pl.BlockSpec((tb, s_dim), lambda i: (i, 0)),       # activations: batch-tiled
            pl.BlockSpec((s_dim, s_dim), lambda i: (0, 0)),    # W1 resident
            pl.BlockSpec((1, s_dim), lambda i: (0, 0)),        # b1 resident
            pl.BlockSpec((s_dim, s_dim), lambda i: (0, 0)),    # W2 resident
            pl.BlockSpec((1, s_dim), lambda i: (0, 0)),        # b2 resident
            pl.BlockSpec((s_dim, OUT_PAD), lambda i: (0, 0)),  # fused head weights resident
            pl.BlockSpec((1, OUT_PAD), lambda i: (0, 0)),      # fused head bias resident
            pl.BlockSpec((1, OUT_PAD), lambda i: (0, 0)),      # sigma-column selector resident
        ],
        out_specs=pl.BlockSpec((tb, OUT_PAD), lambda i: (i, 0)),
        compiler_params=pltpu.CompilerParams(**cp_kwargs),
        cost_estimate=cost,
    )(s_in, w1, b1, w2, b2, w_heads, b_heads, sp_mask)

    slab = slab[:B]
    mu_o = slab[:, :o_dim]
    sigma_o = slab[:, o_dim:2 * o_dim]
    mu_a = slab[:, 2 * o_dim:2 * o_dim + a_dim]
    sigma_a = slab[:, 2 * o_dim + a_dim:2 * o_dim + 2 * a_dim]
    return mu_o, sigma_o, mu_a, sigma_a


# -----------------------------------------------------------------------------
# Parameter init + pure-JAX reference
# -----------------------------------------------------------------------------
def init_params(key, s_dim, o_dim, a_dim):
    """Deterministic synthetic parameters mirroring Likelihood.__init__.

    PyTorch Linear weight is (out, in); we store the transposed (in, out)
    layout the kernel consumes.  Biases are stored as (1, out).
    """
    def linear(k, d_in, d_out):
        kw, kb = jax.random.split(k)
        bound = 1.0 / jnp.sqrt(d_in)
        w = jax.random.uniform(kw, (d_in, d_out), jnp.float32, -bound, bound)
        b = jax.random.uniform(kb, (1, d_out), jnp.float32, -bound, bound)
        return w, b

    keys = jax.random.split(key, 6)
    w1, b1 = linear(keys[0], s_dim, s_dim)
    w2, b2 = linear(keys[1], s_dim, s_dim)
    w_mo, b_mo = linear(keys[2], s_dim, o_dim)
    w_so, b_so = linear(keys[3], s_dim, o_dim)
    w_ma, b_ma = linear(keys[4], s_dim, a_dim)
    w_sa, b_sa = linear(keys[5], s_dim, a_dim)  # defined but unused in forward
    return dict(
        w1=w1, b1=b1, w2=w2, b2=b2,
        w_mo=w_mo, b_mo=b_mo, w_so=w_so, b_so=b_so,
        w_ma=w_ma, b_ma=b_ma, w_sa=w_sa, b_sa=b_sa,
    )


def reference_forward(s_t, params):
    """Pure-JAX reference for correctness checking."""
    h = jnp.maximum(s_t @ params["w1"] + params["b1"], 0.0)
    h = jnp.maximum(h @ params["w2"] + params["b2"], 0.0)
    mu_o = h @ params["w_mo"] + params["b_mo"]
    sigma_o = 1e-06 + jax.nn.softplus(h @ params["w_so"] + params["b_so"])
    mu_a = h @ params["w_ma"] + params["b_ma"]
    sigma_a = 1e-06 + jax.nn.softplus(mu_a)   # reproduces the PyTorch bug
    return mu_o, sigma_o, mu_a, sigma_a


if __name__ == "__main__":
    s_dim, o_dim, a_dim = 32, 16, 8

    key = jax.random.PRNGKey(0)
    k_small, k_params, k_big = jax.random.split(key, 3)
    params = init_params(k_params, s_dim, o_dim, a_dim)

    # --- f32 path, small batch ------------------------------------------------
    s_small = jax.random.normal(k_small, (8, s_dim), jnp.float32)
    prep_f32 = prepare_likelihood_params(params, use_bf16=False)
    outs = jax.block_until_ready(likelihood_forward(s_small, prep_f32))
    refs = reference_forward(s_small, params)
    for o, r in zip(outs, refs):
        assert o.shape == r.shape and o.dtype == r.dtype
        assert jnp.allclose(o, r, atol=1e-5, rtol=1e-5)

    # --- f32 path, multi-tile ragged grid (cdiv grid, partial last block) ------
    s_big = jax.random.normal(k_big, (200, s_dim), jnp.float32)
    outs_big = jax.block_until_ready(
        likelihood_forward(s_big, prep_f32, batch_tile=64))
    refs_big = reference_forward(s_big, params)
    for o, r in zip(outs_big, refs_big):
        assert o.shape == r.shape
        assert jnp.allclose(o, r, atol=1e-5, rtol=1e-5)

    # --- bf16 MXU operands + bf16 output slab (bandwidth-optimized path) -------
    prep_bf16 = prepare_likelihood_params(params, use_bf16=True)
    outs_bf16 = jax.block_until_ready(
        likelihood_forward(s_small, prep_bf16, out_dtype=jnp.bfloat16))
    for o, r in zip(outs_bf16, refs):
        assert o.shape == r.shape
        assert jnp.allclose(o.astype(jnp.float32), r, atol=5e-2, rtol=5e-2)

    print("KERNEL_OK")
</pallas_src>

<mosaic_0001>
module attributes {stable_mosaic.version = 11 : i64} {
  func.func @likelihood_kernel(%arg0: i32, %arg1: memref<8x32xf32, #tpu.memory_space<vmem>>, %arg2: memref<32x32xf32, #tpu.memory_space<vmem>>, %arg3: memref<1x32xf32, #tpu.memory_space<vmem>>, %arg4: memref<32x32xf32, #tpu.memory_space<vmem>>, %arg5: memref<1x32xf32, #tpu.memory_space<vmem>>, %arg6: memref<32x128xf32, #tpu.memory_space<vmem>>, %arg7: memref<1x128xf32, #tpu.memory_space<vmem>>, %arg8: memref<1x128xf32, #tpu.memory_space<vmem>>, %arg9: memref<8x128xf32, #tpu.memory_space<vmem>>) attributes {dimension_semantics = [#tpu.dimension_semantics<parallel>], iteration_bounds = array<i64: 1>, scalar_prefetch = 0 : i64, scratch_operands = 0 : i64, tpu.core_type = #tpu.core_type<tc>, window_params = [{transform_indices = @transform_0, window_bounds = array<i64: 8, 32>}, {pipeline_mode = #tpu.pipeline_mode<synchronous>, transform_indices = @transform_1, window_bounds = array<i64: 32, 32>}, {pipeline_mode = #tpu.pipeline_mode<synchronous>, transform_indices = @transform_2, window_bounds = array<i64: 1, 32>}, {pipeline_mode = #tpu.pipeline_mode<synchronous>, transform_indices = @transform_3, window_bounds = array<i64: 32, 32>}, {pipeline_mode = #tpu.pipeline_mode<synchronous>, transform_indices = @transform_4, window_bounds = array<i64: 1, 32>}, {pipeline_mode = #tpu.pipeline_mode<synchronous>, transform_indices = @transform_5, window_bounds = array<i64: 32, 128>}, {pipeline_mode = #tpu.pipeline_mode<synchronous>, transform_indices = @transform_6, window_bounds = array<i64: 1, 128>}, {pipeline_mode = #tpu.pipeline_mode<synchronous>, transform_indices = @transform_7, window_bounds = array<i64: 1, 128>}, {transform_indices = @transform_8, window_bounds = array<i64: 8, 128>}]} {
    %c0 = arith.constant 0 : index
    %c0_0 = arith.constant 0 : index
    %0 = vector.load %arg1[%c0, %c0_0] : memref<8x32xf32, #tpu.memory_space<vmem>>, vector<8x32xf32>
    %c0_1 = arith.constant 0 : index
    %c0_2 = arith.constant 0 : index
    %1 = vector.load %arg2[%c0_1, %c0_2] : memref<32x32xf32, #tpu.memory_space<vmem>>, vector<32x32xf32>
    %cst = arith.constant dense<0.000000e+00> : vector<8x32xf32>
    %2 = tpu.matmul %0, %1, %cst {dimension_numbers = #tpu.dot_dimension_numbers<[1], [0], [0], [1], [0, 0, 1, 1], [], []>} : vector<8x32xf32>, vector<32x32xf32>, vector<8x32xf32> -> vector<8x32xf32>
    %c0_3 = arith.constant 0 : index
    %c0_4 = arith.constant 0 : index
    %3 = vector.load %arg3[%c0_3, %c0_4] : memref<1x32xf32, #tpu.memory_space<vmem>>, vector<1x32xf32>
    %4 = vector.broadcast %3 : vector<1x32xf32> to vector<8x32xf32>
    %5 = arith.addf %2, %4 : vector<8x32xf32>
    %cst_5 = arith.constant 0.000000e+00 : f32
    %6 = vector.broadcast %cst_5 : f32 to vector<8x32xf32>
    %7 = arith.maximumf %5, %6 : vector<8x32xf32>
    %c0_6 = arith.constant 0 : index
    %c0_7 = arith.constant 0 : index
    %8 = vector.load %arg4[%c0_6, %c0_7] : memref<32x32xf32, #tpu.memory_space<vmem>>, vector<32x32xf32>
    %cst_8 = arith.constant dense<0.000000e+00> : vector<8x32xf32>
    %9 = tpu.matmul %7, %8, %cst_8 {dimension_numbers = #tpu.dot_dimension_numbers<[1], [0], [0], [1], [0, 0, 1, 1], [], []>} : vector<8x32xf32>, vector<32x32xf32>, vector<8x32xf32> -> vector<8x32xf32>
    %c0_9 = arith.constant 0 : index
    %c0_10 = arith.constant 0 : index
    %10 = vector.load %arg5[%c0_9, %c0_10] : memref<1x32xf32, #tpu.memory_space<vmem>>, vector<1x32xf32>
    %11 = vector.broadcast %10 : vector<1x32xf32> to vector<8x32xf32>
    %12 = arith.addf %9, %11 : vector<8x32xf32>
    %cst_11 = arith.constant 0.000000e+00 : f32
    %13 = vector.broadcast %cst_11 : f32 to vector<8x32xf32>
    %14 = arith.maximumf %12, %13 : vector<8x32xf32>
    %c0_12 = arith.constant 0 : index
    %c0_13 = arith.constant 0 : index
    %15 = vector.load %arg6[%c0_12, %c0_13] : memref<32x128xf32, #tpu.memory_space<vmem>>, vector<32x128xf32>
    %cst_14 = arith.constant dense<0.000000e+00> : vector<8x128xf32>
    %16 = tpu.matmul %14, %15, %cst_14 {dimension_numbers = #tpu.dot_dimension_numbers<[1], [0], [0], [1], [0, 0, 1, 1], [], []>} : vector<8x32xf32>, vector<32x128xf32>, vector<8x128xf32> -> vector<8x128xf32>
    %c0_15 = arith.constant 0 : index
    %c0_16 = arith.constant 0 : index
    %17 = vector.load %arg7[%c0_15, %c0_16] : memref<1x128xf32, #tpu.memory_space<vmem>>, vector<1x128xf32>
    %18 = vector.broadcast %17 : vector<1x128xf32> to vector<8x128xf32>
    %19 = arith.addf %16, %18 : vector<8x128xf32>
    %cst_17 = arith.constant 0.000000e+00 : f32
    %20 = vector.broadcast %cst_17 : f32 to vector<8x128xf32>
    %21 = arith.maximumf %19, %20 : vector<8x128xf32>
    %22 = vector.broadcast %cst_17 : f32 to vector<8x128xf32>
    %23 = arith.subf %19, %22 : vector<8x128xf32>
    %24 = arith.cmpf one, %23, %23 : vector<8x128xf32>
    %25 = vector.broadcast %cst_17 : f32 to vector<8x128xf32>
    %26 = arith.addf %19, %25 : vector<8x128xf32>
    %27 = math.absf %23 : vector<8x128xf32>
    %cst_18 = arith.constant 0.000000e+00 : f32
    %28 = vector.broadcast %cst_18 : f32 to vector<8x128xf32>
    %29 = arith.subf %28, %27 : vector<8x128xf32>
    %30 = math.exp %29 : vector<8x128xf32>
    %31 = math.log1p %30 : vector<8x128xf32>
    %32 = arith.addf %21, %31 : vector<8x128xf32>
    %33 = arith.select %24, %26, %32 : vector<8x128xi1>, vector<8x128xf32>
    %cst_19 = arith.constant 9.99999997E-7 : f32
    %34 = vector.broadcast %cst_19 : f32 to vector<8x128xf32>
    %35 = arith.addf %34, %33 : vector<8x128xf32>
    %c0_20 = arith.constant 0 : index
    %c0_21 = arith.constant 0 : index
    %36 = vector.load %arg8[%c0_20, %c0_21] : memref<1x128xf32, #tpu.memory_space<vmem>>, vector<1x128xf32>
    %37 = vector.shape_cast %36 : vector<1x128xf32> to vector<1x128xf32>
    %38 = vector.broadcast %37 : vector<1x128xf32> to vector<8x128xf32>
    %cst_22 = arith.constant 5.000000e-01 : f32
    %39 = vector.broadcast %cst_22 : f32 to vector<8x128xf32>
    %40 = arith.cmpf ogt, %38, %39 : vector<8x128xf32>
    %41 = arith.select %40, %35, %19 : vector<8x128xi1>, vector<8x128xf32>
    %c0_23 = arith.constant 0 : index
    %c0_24 = arith.constant 0 : index
    %42 = vector.load %arg9[%c0_23, %c0_24] : memref<8x128xf32, #tpu.memory_space<vmem>>, vector<8x128xf32>
    tpu.vector_store %arg9[%c0_23, %c0_24], %41 {strides = array<i32>} : memref<8x128xf32, #tpu.memory_space<vmem>>, vector<8x128xf32>,
    return
  }
  func.func @transform_0(%arg0: i32) -> (i32, i32) {
    %c0_i32 = arith.constant 0 : i32
    %c0_i32_0 = arith.constant 0 : i32
    return %arg0, %c0_i32 : i32, i32
  }
  func.func @transform_1(%arg0: i32) -> (i32, i32) {
    %c0_i32 = arith.constant 0 : i32
    %c0_i32_0 = arith.constant 0 : i32
    %c0_i32_1 = arith.constant 0 : i32
    return %c0_i32, %c0_i32_0 : i32, i32
  }
  func.func @transform_2(%arg0: i32) -> (i32, i32) {
    %c0_i32 = arith.constant 0 : i32
    %c0_i32_0 = arith.constant 0 : i32
    %c0_i32_1 = arith.constant 0 : i32
    return %c0_i32, %c0_i32_0 : i32, i32
  }
  func.func @transform_3(%arg0: i32) -> (i32, i32) {
    %c0_i32 = arith.constant 0 : i32
    %c0_i32_0 = arith.constant 0 : i32
    %c0_i32_1 = arith.constant 0 : i32
    return %c0_i32, %c0_i32_0 : i32, i32
  }
  func.func @transform_4(%arg0: i32) -> (i32, i32) {
    %c0_i32 = arith.constant 0 : i32
    %c0_i32_0 = arith.constant 0 : i32
    %c0_i32_1 = arith.constant 0 : i32
    return %c0_i32, %c0_i32_0 : i32, i32
  }
  func.func @transform_5(%arg0: i32) -> (i32, i32) {
    %c0_i32 = arith.constant 0 : i32
    %c0_i32_0 = arith.constant 0 : i32
    %c0_i32_1 = arith.constant 0 : i32
    return %c0_i32, %c0_i32_0 : i32, i32
  }
  func.func @transform_6(%arg0: i32) -> (i32, i32) {
    %c0_i32 = arith.constant 0 : i32
    %c0_i32_0 = arith.constant 0 : i32
    %c0_i32_1 = arith.constant 0 : i32
    return %c0_i32, %c0_i32_0 : i32, i32
  }
  func.func @transform_7(%arg0: i32) -> (i32, i32) {
    %c0_i32 = arith.constant 0 : i32
    %c0_i32_0 = arith.constant 0 : i32
    %c0_i32_1 = arith.constant 0 : i32
    return %c0_i32, %c0_i32_0 : i32, i32
  }
  func.func @transform_8(%arg0: i32) -> (i32, i32) {
    %c0_i32 = arith.constant 0 : i32
    %c0_i32_0 = arith.constant 0 : i32
    return %arg0, %c0_i32 : i32, i32
  }
}

</mosaic_0001>

<bundles_post_ra>
// kernel: tpu_custom_call.1
= control target key start
LH: loop header
LB: loop body
LE: loop exit
PB: predicated region body
PF: predicated region fallthrough
CT: control target
= control target key end

     0   :  { %13 = vsyncpa [#allocation3], 0  ;;  %s461_s0 = inlined_call_operand.hbm [shape: f32[8,32], index: 0, kind: input, shape index: {}]   ;;  %s462_s1 = inlined_call_operand.hbm [shape: f32[32,32], index: 1, kind: input, shape index: {}]   ;;  %s463_s2 = inlined_call_operand.vmem [shape: f32[1,32], index: 2, kind: input, shape index: {}]   ;;  %s464_s3 = inlined_call_operand.hbm [shape: f32[32,32], index: 3, kind: input, shape index: {}]   ;;  %s465_s4 = inlined_call_operand.vmem [shape: f32[1,32], index: 4, kind: input, shape index: {}]   ;;  %s466_s5 = inlined_call_operand.hbm [shape: f32[32,128], index: 5, kind: input, shape index: {}]   ;;  %s467_s6 = inlined_call_operand.vmem [shape: f32[1,128], index: 6, kind: input, shape index: {}]   ;;  %s468_s7 = inlined_call_operand.vmem [shape: f32[1,128], index: 7, kind: input, shape index: {}]   ;;  %s469_s8 = inlined_call_operand.hbm [shape: f32[8,128], index: 8, kind: output, shape index: {}]  }
   0x1   :  { %14 = vsyncpa [#allocation6], 0 }
   0x2   :  { %15 = vsyncpa [#allocation9], 0  ;;  %s32_s29 = sshll.u32 %s462_s1, 4  ;;  %s33_s29 = int_to_ptr.hbm [resolvable:$true] %s32_s29 }
   0x3   :  { %16 = vsyncpa [#allocation4], 0  ;;  %s379_s30 = smov [#allocation5]   ;;  %s22_s12 = sshll.u32 %s461_s0, 4  ;;  %s23_s12 = int_to_ptr.hbm [resolvable:$true] %s22_s12 }
   0x4   :  { %s34_s9 = sshll.u32 %s379_s30, 4  ;;  %s380_s13 = smov 128   ;;  %s35_s9 = int_to_ptr.vmem [resolvable:$true] %s34_s9 }
   0x5   :  { %s381_s14 = smov 8   ;;  %s382_s15 = smov [#allocation2]  }
   0x6   :  { %40 = dma.hbm_to_vmem [thread:$0]  %s33_s29, 512, %s35_s9, [#allocation6], %s380_s13, %s380_s13, %s381_s14  }
   0x7   :  { %s24_s16 = sshll.u32 %s382_s15, 4  ;;  %s47_s19 = sshll.u32 %s464_s3, 4  ;;  %s25_s16 = int_to_ptr.vmem [resolvable:$true] %s24_s16  ;;  %s48_s19 = int_to_ptr.hbm [resolvable:$true] %s47_s19 }
   0x8   :  { %27 = dma.hbm_to_vmem [thread:$0]  %s23_s12, 128, %s25_s16, [#allocation3]  }
   0x9   :  { %s62_s21 = sshll.u32 %s466_s5, 4  ;;  %s383_s22 = smov [#allocation7]   ;;  %s63_s21 = int_to_ptr.hbm [resolvable:$true] %s62_s21 }
   0xa   :  { %s49_s23 = sshll.u32 %s383_s22, 4  ;;  %s384_s0 = smov [#allocation8]   ;;  %s50_s23 = int_to_ptr.vmem [resolvable:$true] %s49_s23 }
   0xb   :  { %55 = dma.hbm_to_vmem [thread:$0]  %s48_s19, 512, %s50_s23, [#allocation6], %s380_s13, %s380_s13, %s381_s14  }
   0xc   :  { %s64_s24 = sshll.u32 %s384_s0, 4  ;;  %s65_s24 = int_to_ptr.vmem [resolvable:$true] %s64_s24 }
   0xd   :  { %70 = dma.hbm_to_vmem [thread:$0]  %s63_s21, 512, %s65_s24, [#allocation9], %s380_s13, %s380_s13, %s381_s14  }
   0xe   :  { %371 = dma.done.wait [#allocation3], 128  }
   0xf   :  { %372 = vsyncadd [#allocation3], 4294967168 }
  0x10   :  { %373 = dma.done.wait [#allocation6], 1024  }
  0x11   :  { %374 = vsyncadd [#allocation6], 4294966272 }
  0x12   :  { %375 = dma.done.wait [#allocation9], 512  }
  0x13   :  { %376 = vsyncadd [#allocation9], 4294966784  ;;  %v95_v0 = vld [vmem:[#allocation5 + $0x18] sm:$0xff]  ;;  %v94_v1 = vld [vmem:[#allocation5 + $0x10] sm:$0xff]  ;;  %vm100_vm0 = vcmask 261120   ;;  %s221_s10 = sshll.u32 %s469_s8, 4  ;;  %s222_s10 = int_to_ptr.hbm [resolvable:$true] %s221_s10 }
  0x14   :  { %116 = vmatpush.msra.mxu0 %v95_v0  ;;  %v128_v2 = vld [vmem:[#allocation7 + $0x18] sm:$0xff]  ;;  %v93_v3 = vld [vmem:[#allocation5 + $0x8] sm:$0xff]  ;;  %v92_v4 = vld [vmem:[#allocation5] sm:$0xff] }
  0x15   :  { %148 = vmatpush.msra.mxu1 %v128_v2  ;;  %v91_v5 = vld [vmem:[#allocation2] sm:$0xff]  ;;  %v127_v6 = vld [vmem:[#allocation7 + $0x10] sm:$0xff]  ;;  %v126_v7 = vld [vmem:[#allocation7 + $0x8] sm:$0xff] }
  0x16   :  { %117 = vmatpush.msra.mxu0 %v94_v1  ;;  %v125_v8 = vld [vmem:[#allocation7] sm:$0xff]  ;;  %v160_v9 = vld [vmem:[#allocation8 + $0x18] sm:$0xff]  ;;  %v159_v14 = vld [vmem:[#allocation8 + $0x10] sm:$0xff] }
  0x17   :  { %149 = vmatpush.msra.mxu1 %v127_v6  ;;  %180 = vmatpush.msra.mxu2 %v160_v9  ;;  %v243_v10 = vld [vmem:[%s463_s2] ss:$0 sm:$0xff]  ;;  %v158_v15 = vld [vmem:[#allocation8 + $0x8] sm:$0xff]  ;;  %v157_v16 = vld [vmem:[#allocation8] sm:$0xff] }
  0x18   :  { %118 = vmatpush.msra.mxu0 %v93_v3  ;;  %v244_v17 = vld [vmem:[%s465_s4] ss:$0 sm:$0xff] }
  0x19   :  { %150 = vmatpush.msra.mxu1 %v126_v7  ;;  %181 = vmatpush.msra.mxu2 %v159_v14  ;;  %v245_v21 = vld [vmem:[%s467_s6] ss:$0 sm:$0xff]  ;;  %s385_s6 = smov [#allocation10]  }
  0x1a   :  { %119 = vmatpush.msra.mxu0 %v92_v4  ;;  %v246_v36 = vld [vmem:[%s468_s7] ss:$0 sm:$0xff]  ;;  %s219_s29 = sshll.u32 %s385_s6, 4  ;;  %s220_s29 = int_to_ptr.vmem [resolvable:$true] %s219_s29 }
  0x1b   :  { %233 = vmatmul.msk.f32.vlgmr.msra.gmra.mxu0 %vm100_vm0, %v91_v5  ;;  %151 = vmatpush.msra.mxu1 %v125_v8  ;;  %vm211_vm3 = vcmp.gt.f32.partialorder %v246_v36, 0.5 }
  0x1c   :  { %182 = vmatpush.msra.mxu2 %v158_v15 }
  0x1e   :  { %183 = vmatpush.msra.mxu2 %v157_v16 }
  0x98   :  { %v121_v11 = vpop.f32.mrf.mxu0 }
  0x99   :  { %v122_v12 = vadd.f32 %v243_v10, %v121_v11 }
  0x9b   :  { %v124_v13 = vmax.f32 %v122_v12, 0.0 }
  0x9d   :  { %234 = vmatmul.msk.f32.vlgmr.msra.gmra.mxu1 %vm100_vm0, %v124_v13 }
 0x11a   :  { %v153_v18 = vpop.f32.mrf.mxu1 }
 0x11b   :  { %v154_v19 = vadd.f32 %v244_v17, %v153_v18 }
 0x11d   :  { %v156_v20 = vmax.f32 %v154_v19, 0.0 }
 0x11f   :  { %235 = vmatmul.msk.f32.vlgmr.msra.gmra.mxu2 %vm100_vm0, %v156_v20 }
 0x1a2   :  { %v185_v22 = vpop.f32.mrf.mxu2 }
 0x1a3   :  { %v186_v23 = vadd.f32 %v245_v21, %v185_v22 }
 0x1a5   :  { %v191_v24 = vand.u32 2147483647, %v186_v23  ;;  %v188_v35 = vmax.f32 %v186_v23, 0.0  ;;  %vm189_vm2 = vcmp.ne.f32.partialorder %v186_v23, %v186_v23 }
 0x1a7   :  { %v192_v25 = vsub.f32 0.0, %v191_v24 }
 0x1a9   :  { %v193_v26 = vmul.f32 1.442695, %v192_v25 }
 0x1ab   :  { %247 = vpow2.f32 %v193_v26 }
 0x1b1   :  { %v248_v27 = vpop.eup %247 }
 0x1b2   :  { %v195_v28 = vadd.f32 1.0, %v248_v27  ;;  %v198_v29 = vmul.f32 -0.5, %v248_v27  ;;  %v201_v31 = vand.u32 2147483647, %v248_v27 }
 0x1b4   :  { %249 = vlog2.f32 %v195_v28  ;;  %v199_v30 = vadd.f32 1.0, %v198_v29  ;;  %vm202_vm1 = vcmp.lt.f32.partialorder %v201_v31, 0.0004427343 }
 0x1b6   :  { %v200_v34 = vmul.f32 %v248_v27, %v199_v30 }
 0x1ba   :  { %v250_v32 = vpop.eup %249 }
 0x1bb   :  { %v197_v33 = vmul.f32 0.6931472, %v250_v32 }
 0x1bd   :  { %v203_v37 = vsel %vm202_vm1, %v200_v34, %v197_v33 }
 0x1be   :  { %v204_v38 = vadd.f32 %v203_v37, %v188_v35 }
 0x1c0   :  { %v205_v39 = vsel %vm189_vm2, %v186_v23, %v204_v38 }
 0x1c1   :  { %v206_v40 = vadd.f32 1e-06, %v205_v39 }
 0x1c3   :  { %v212_v41 = vsel %vm211_vm3, %v206_v40, %v186_v23 }
 0x1c4   :  { %213 = vst [vmem:[#allocation10] sm:$0xff] %v212_v41 }
 0x1c5   :  { %224 = dma.vmem_to_hbm [thread:$0]  %s220_s29, 128, %s222_s10, [#allocation4]  }
 0x1c6   :  { %377 = dma.done.wait [#allocation4], 128  }
 0x1c7   :  { %378 = vsyncadd [#allocation4], 4294967168 }
 0x1c8   :  { %229 = vsyncpa [#allocation3], 1 }
 0x1c9   :  { %230 = vsyncpa [#allocation6], 1 }
 0x1ca   :  { %231 = vsyncpa [#allocation9], 1 }
 0x1cb   :  { %232 = vsyncpa [#allocation4], 1 }

</bundles_post_ra>
